<compile_context>
chip_gen: v6e
topology: v6e:2x2x1
jax: 0.10.0
libtpu: 0.0.40
codegen_flags: <defaults>
</compile_context>

<pallas_src>
import functools

import jax
import jax.numpy as jnp
from jax.experimental import pallas as pl
from jax.experimental.pallas import tpu as pltpu


def _round_up(n: int, m: int) -> int:
    return ((n + m - 1) // m) * m


def _default_elementwise_dtype():
    """bf16 Swish/bias on chips with a bf16 VPU/EUP (v6e/v7x), f32 otherwise."""
    try:
        kind = jax.devices()[0].device_kind.lower()
    except Exception:  # pragma: no cover - defensive
        return jnp.float32
    for tag in ("v2", "v3", "v4", "v5"):
        if tag in kind:
            return jnp.float32
    return jnp.bfloat16


def _expand_t(t, batch, dimt, dtype):
    """Mirror the torch glue: scalar t -> (B, dimt); (B,) -> (B, 1)."""
    t = jnp.asarray(t, dtype)
    if t.ndim == 0:
        t = jnp.full((batch, dimt), t, dtype)
    elif t.ndim == 1:
        assert dimt == 1, "1-D t is only supported when dimt == 1"
        t = t.reshape(batch, 1)
    else:
        assert t.shape == (batch, dimt), (t.shape, batch, dimt)
    return t


def _swish(v):
    return jax.nn.sigmoid(v) * v


# ----------------------------------------------------------------------------
# One-time parameter preparation (hoisted out of the per-call wrapper).
# ----------------------------------------------------------------------------
def prepare_params(params, dimx, *, compute_dtype=jnp.bfloat16,
                   elementwise_dtype=None):
    if elementwise_dtype is None:
        elementwise_dtype = _default_elementwise_dtype()
    w1, b1 = params["w1"], params["b1"]
    w2, b2 = params["w2"], params["b2"]
    w3, b3 = params["w3"], params["b3"]
    din = w1.shape[0]
    dimt = din - dimx
    assert dimt >= 1, (din, dimx)
    # dimt == 1: the t contribution is a rank-1 broadcast add on the VPU; keep
    # that slice (and t) in f32 so no per-grid-step cast is needed.
    w1t = w1[dimx:, :].astype(jnp.float32 if dimt == 1 else compute_dtype)
    return {
        "w1x": w1[:dimx, :].astype(compute_dtype),
        "w1t": w1t,
        "b1": b1.reshape(1, -1).astype(elementwise_dtype),
        "w2": w2.astype(compute_dtype),
        "b2": b2.reshape(1, -1).astype(elementwise_dtype),
        "w3": w3.astype(compute_dtype),
        "b3": b3.reshape(1, -1).astype(jnp.float32),
    }


# ----------------------------------------------------------------------------
# Pallas kernel: full MLP hot path for one batch tile, split into n_sub
# independent sub-tiles so MXU matmuls overlap VPU/EUP Swish work.
# ----------------------------------------------------------------------------
def _mlp_kernel(dimt, n_sub, x_ref, t_ref, w1x_ref, w1t_ref, b1_ref,
                w2_ref, b2_ref, w3_ref, b3_ref, out_ref):
    elem = b1_ref.dtype      # Swish/bias dtype: f32 on v5e, bf16 on v6e/v7x
    mm = w2_ref.dtype        # MXU operand dtype (bf16)

    w1x = w1x_ref[...]
    w1t = w1t_ref[...]
    b1 = b1_ref[...]
    w2 = w2_ref[...]
    b2 = b2_ref[...]
    w3 = w3_ref[...]
    b3 = b3_ref[...]         # f32

    tb = x_ref.shape[0]
    sub = tb // n_sub
    # Static unroll over independent sub-tiles: the scheduler can co-issue
    # sub-tile j's vmatmul with sub-tile j-1's Swish / bias / cast.
    for j in range(n_sub):
        rows = pl.ds(j * sub, sub)
        x = x_ref[rows, :]
        tt = t_ref[rows, :]

        # ---- Layer 1: fused concat([x, t]) @ W1 (f32 MXU accumulation) -----
        h = jnp.dot(x, w1x, preferred_element_type=jnp.float32)
        if dimt == 1:
            h = h + tt.astype(jnp.float32) * w1t   # rank-1 broadcast add (f32)
        else:
            h = h + jnp.dot(tt, w1t, preferred_element_type=jnp.float32)
        h = _swish(h.astype(elem) + b1).astype(mm)

        # ---- Layer 2: Linear(emb -> emb) + Swish ----------------------------
        h2 = jnp.dot(h, w2, preferred_element_type=jnp.float32)
        h2 = _swish(h2.astype(elem) + b2).astype(mm)

        # ---- Output layer: Linear(emb -> dimx), unpadded f32 store ----------
        o = jnp.dot(h2, w3, preferred_element_type=jnp.float32)
        out_ref[rows, :] = (o + b3).astype(out_ref.dtype)


# ----------------------------------------------------------------------------
# Wrapper: glue (flatten / t broadcast), batch tiling, BlockSpecs, pallas_call
# ----------------------------------------------------------------------------
def concat_mat_mlp_forward(x, t, params, dimx1, dimx2, *, tb=None,
                           compute_dtype=jnp.bfloat16, elementwise_dtype=None):
    """Pallas implementation of ConcatMatMLP.forward (actnorm_first=False,
    num_hidden_layers=2).

    x: (B, dimx1, dimx2) float32
    t: python float, 0-d array, (B,) or (B, dimt) array
    params: raw {"w1","b1","w2","b2","w3","b3"} or the output of prepare_params
    returns (B, dimx1, dimx2) float32
    """
    B = x.shape[0]
    dimx = dimx1 * dimx2

    prep = params if "w1x" in params else prepare_params(
        params, dimx, compute_dtype=compute_dtype,
        elementwise_dtype=elementwise_dtype)
    w1x, w1t = prep["w1x"], prep["w1t"]
    b1, w2, b2, w3, b3 = prep["b1"], prep["w2"], prep["b2"], prep["w3"], prep["b3"]
    emb = w1x.shape[1]
    dimt = w1t.shape[0]
    assert w1x.shape[0] == dimx and w3.shape[1] == dimx

    cd = w1x.dtype  # matmul operand dtype

    # --- glue (matches torch semantics): flatten x, broadcast scalar t -------
    x_flat = x.reshape(B, dimx).astype(cd)
    t_arr = _expand_t(t, B, dimt, jnp.float32 if dimt == 1 else cd)

    # --- batch tiling ---------------------------------------------------------
    if tb is None:
        b8 = _round_up(B, 8)
        g = max(1, pl.cdiv(b8, 1024))      # big tiles: amortize grid overhead
        if b8 >= 512:
            g = max(g, 2)                  # >= 2 steps so both v7x TCs run
        tb = _round_up(pl.cdiv(b8, g), 8)
    tb = max(8, _round_up(int(tb), 8))
    b_pad = _round_up(B, tb)
    if b_pad != B:
        x_flat = jnp.pad(x_flat, ((0, b_pad - B), (0, 0)))
        t_arr = jnp.pad(t_arr, ((0, b_pad - B), (0, 0)))
    grid = (b_pad // tb,)

    # Intra-tile sub-tiling (keeps sub-tile rows a multiple of 8).
    n_sub = 2 if tb % 16 == 0 else 1

    const_map = lambda i: (0, 0)
    in_specs = [
        pl.BlockSpec((tb, dimx), lambda i: (i, 0)),   # x tile (pipelined)
        pl.BlockSpec((tb, dimt), lambda i: (i, 0)),   # t tile (pipelined)
        pl.BlockSpec((dimx, emb), const_map),         # W1[:dimx]  (resident)
        pl.BlockSpec((dimt, emb), const_map),         # W1[dimx:]  (resident)
        pl.BlockSpec((1, emb), const_map),            # b1
        pl.BlockSpec((emb, emb), const_map),          # W2
        pl.BlockSpec((1, emb), const_map),            # b2
        pl.BlockSpec((emb, dimx), const_map),         # W3 (unpadded)
        pl.BlockSpec((1, dimx), const_map),           # b3 (unpadded, f32)
    ]
    out_specs = pl.BlockSpec((tb, dimx), lambda i: (i, 0))

    # --- VMEM budget: never below the default, raised only when needed -------
    cd_size = jnp.dtype(cd).itemsize
    t_size = jnp.dtype(t_arr.dtype).itemsize
    elem_size = jnp.dtype(b1.dtype).itemsize
    weight_bytes = ((dimx * emb + emb * emb + emb * dimx) * cd_size
                    + dimt * emb * jnp.dtype(w1t.dtype).itemsize)
    bias_bytes = 2 * emb * elem_size + dimx * 4
    io_bytes = 2 * tb * (dimx * cd_size + dimt * t_size) + 2 * tb * dimx * 4
    inter_bytes = 8 * (tb // n_sub) * emb * 4
    need = 2 * (weight_bytes + bias_bytes) + io_bytes + inter_bytes
    vmem_limit = int(min(max(2 * need, 32 << 20), 56 << 20))

    cost = pl.CostEstimate(
        flops=2 * b_pad * (dimx * emb + dimt * emb + emb * emb + emb * dimx),
        transcendentals=4 * b_pad * emb,   # ~2 EUP ops per sigmoid, 2 layers
        bytes_accessed=(b_pad * (dimx * cd_size + dimt * t_size)
                        + b_pad * dimx * 4 + weight_bytes + bias_bytes),
    )

    out = pl.pallas_call(
        functools.partial(_mlp_kernel, dimt, n_sub),
        out_shape=jax.ShapeDtypeStruct((b_pad, dimx), jnp.float32),
        grid=grid,
        in_specs=in_specs,
        out_specs=out_specs,
        compiler_params=pltpu.CompilerParams(
            dimension_semantics=("parallel",),
            vmem_limit_bytes=vmem_limit),
        cost_estimate=cost,
    )(x_flat, t_arr, w1x, w1t, b1, w2, b2, w3, b3)

    if b_pad != B:
        out = out[:B]
    return out.reshape(B, dimx1, dimx2)


# ----------------------------------------------------------------------------
# Deterministic parameter initialization (mimics nn.Linear's uniform init)
# ----------------------------------------------------------------------------
def init_params(key, din, emb, dout):
    ks = jax.random.split(key, 6)

    def linear_init(kw, kb, fan_in, fan_out):
        bound = 1.0 / jnp.sqrt(fan_in)
        w = jax.random.uniform(kw, (fan_in, fan_out), jnp.float32, -bound, bound)
        b = jax.random.uniform(kb, (1, fan_out), jnp.float32, -bound, bound)
        return w, b

    w1, b1 = linear_init(ks[0], ks[1], din, emb)
    w2, b2 = linear_init(ks[2], ks[3], emb, emb)
    w3, b3 = linear_init(ks[4], ks[5], emb, dout)
    return {"w1": w1, "b1": b1, "w2": w2, "b2": b2, "w3": w3, "b3": b3}


if __name__ == "__main__":
    # Module defaults: dimx1 = dimx2 = 3, dimt = 1, emb_size = 256.
    B, dimx1, dimx2, dimt, emb = 8, 3, 3, 1, 256
    dimx = dimx1 * dimx2

    key = jax.random.PRNGKey(0)
    kx, kp = jax.random.split(key)
    x = jax.random.normal(kx, (B, dimx1, dimx2), dtype=jnp.float32)
    t = 0.5  # scalar time -> broadcast to (B, 1) like the torch module

    params = init_params(kp, dimx + dimt, emb, dimx)
    elem_dtype = _default_elementwise_dtype()
    prep = prepare_params(params, dimx, elementwise_dtype=elem_dtype)  # hoisted

    y = concat_mat_mlp_forward(x, t, prep, dimx1, dimx2)
    y = jax.block_until_ready(y)
    assert y.shape == (B, dimx1, dimx2), y.shape

    # --- pure-JAX references --------------------------------------------------
    def ref_f32(x, t, params):
        b = x.shape[0]
        t_col = _expand_t(t, b, 1, jnp.float32)
        xin = jnp.concatenate([x.reshape(b, -1), t_col], axis=1)
        h = xin @ params["w1"] + params["b1"]
        h = jax.nn.sigmoid(h) * h
        h = h @ params["w2"] + params["b2"]
        h = jax.nn.sigmoid(h) * h
        return (h @ params["w3"] + params["b3"]).reshape(b, dimx1, dimx2)

    def ref_matched(x, t, params, elem):
        # Same math with the kernel's numerics: bf16 MXU operands, f32
        # accumulation, Swish/bias in `elem` dtype, f32 output bias.
        b = x.shape[0]
        mm = jnp.bfloat16
        xf = x.reshape(b, -1).astype(mm)
        t_col = _expand_t(t, b, 1, jnp.float32)
        h = jnp.dot(xf, params["w1"][:dimx].astype(mm),
                    preferred_element_type=jnp.float32)
        h = h + t_col * params["w1"][dimx:].astype(jnp.float32)
        h = h.astype(elem) + params["b1"].astype(elem)
        h = (jax.nn.sigmoid(h) * h).astype(mm)
        h2 = jnp.dot(h, params["w2"].astype(mm),
                     preferred_element_type=jnp.float32)
        h2 = h2.astype(elem) + params["b2"].astype(elem)
        h2 = (jax.nn.sigmoid(h2) * h2).astype(mm)
        o = jnp.dot(h2, params["w3"].astype(mm),
                    preferred_element_type=jnp.float32)
        o = o + params["b3"].astype(jnp.float32)
        return o.reshape(b, dimx1, dimx2)

    assert jnp.allclose(y, ref_matched(x, t, params, elem_dtype),
                        atol=2e-2, rtol=2e-2)
    assert jnp.allclose(y, ref_f32(x, t, params), atol=6e-2, rtol=6e-2)

    # Second config: exercises grid > 1, sub-tiling off (tb=8), batch-remainder
    # padding, and a (B, 1) tensor t.
    B2 = 37
    x2 = jax.random.normal(jax.random.PRNGKey(1), (B2, dimx1, dimx2), jnp.float32)
    t2 = jax.random.uniform(jax.random.PRNGKey(2), (B2, 1), jnp.float32)
    y2 = jax.block_until_ready(
        concat_mat_mlp_forward(x2, t2, prep, dimx1, dimx2, tb=8))
    assert y2.shape == (B2, dimx1, dimx2), y2.shape
    assert jnp.allclose(y2, ref_matched(x2, t2, params, elem_dtype),
                        atol=2e-2, rtol=2e-2)
    assert jnp.allclose(y2, ref_f32(x2, t2, params), atol=6e-2, rtol=6e-2)

    # Third config: larger batch to exercise the big-tile / sub-tiling path.
    B3 = 600
    x3 = jax.random.normal(jax.random.PRNGKey(3), (B3, dimx1, dimx2), jnp.float32)
    y3 = jax.block_until_ready(concat_mat_mlp_forward(x3, 0.25, prep, dimx1, dimx2))
    assert y3.shape == (B3, dimx1, dimx2), y3.shape
    assert jnp.allclose(y3, ref_matched(x3, 0.25, params, elem_dtype),
                        atol=2e-2, rtol=2e-2)

    print("KERNEL_OK")
</pallas_src>

<mosaic_0001>
module attributes {stable_mosaic.version = 11 : i64} {
  func.func @_mlp_kernel(%arg0: i32, %arg1: memref<8x9xbf16, #tpu.memory_space<vmem>>, %arg2: memref<8x1xf32, #tpu.memory_space<vmem>>, %arg3: memref<9x256xbf16, #tpu.memory_space<vmem>>, %arg4: memref<1x256xf32, #tpu.memory_space<vmem>>, %arg5: memref<1x256xbf16, #tpu.memory_space<vmem>>, %arg6: memref<256x256xbf16, #tpu.memory_space<vmem>>, %arg7: memref<1x256xbf16, #tpu.memory_space<vmem>>, %arg8: memref<256x9xbf16, #tpu.memory_space<vmem>>, %arg9: memref<1x9xf32, #tpu.memory_space<vmem>>, %arg10: memref<8x9xf32, #tpu.memory_space<vmem>>) attributes {dimension_semantics = [#tpu.dimension_semantics<parallel>], iteration_bounds = array<i64: 1>, scalar_prefetch = 0 : i64, scratch_operands = 0 : i64, tpu.core_type = #tpu.core_type<tc>, window_params = [{transform_indices = @transform_0, window_bounds = array<i64: 8, 9>}, {transform_indices = @transform_1, window_bounds = array<i64: 8, 1>}, {pipeline_mode = #tpu.pipeline_mode<synchronous>, transform_indices = @transform_2, window_bounds = array<i64: 9, 256>}, {pipeline_mode = #tpu.pipeline_mode<synchronous>, transform_indices = @transform_3, window_bounds = array<i64: 1, 256>}, {pipeline_mode = #tpu.pipeline_mode<synchronous>, transform_indices = @transform_4, window_bounds = array<i64: 1, 256>}, {pipeline_mode = #tpu.pipeline_mode<synchronous>, transform_indices = @transform_5, window_bounds = array<i64: 256, 256>}, {pipeline_mode = #tpu.pipeline_mode<synchronous>, transform_indices = @transform_6, window_bounds = array<i64: 1, 256>}, {pipeline_mode = #tpu.pipeline_mode<synchronous>, transform_indices = @transform_7, window_bounds = array<i64: 256, 9>}, {pipeline_mode = #tpu.pipeline_mode<synchronous>, transform_indices = @transform_8, window_bounds = array<i64: 1, 9>}, {transform_indices = @transform_9, window_bounds = array<i64: 8, 9>}]} {
    %c0 = arith.constant 0 : index
    %c0_0 = arith.constant 0 : index
    %0 = vector.load %arg3[%c0, %c0_0] : memref<9x256xbf16, #tpu.memory_space<vmem>>, vector<9x256xbf16>
    %c0_1 = arith.constant 0 : index
    %c0_2 = arith.constant 0 : index
    %1 = vector.load %arg4[%c0_1, %c0_2] : memref<1x256xf32, #tpu.memory_space<vmem>>, vector<1x256xf32>
    %c0_3 = arith.constant 0 : index
    %c0_4 = arith.constant 0 : index
    %2 = vector.load %arg5[%c0_3, %c0_4] : memref<1x256xbf16, #tpu.memory_space<vmem>>, vector<1x256xbf16>
    %c0_5 = arith.constant 0 : index
    %c0_6 = arith.constant 0 : index
    %3 = vector.load %arg6[%c0_5, %c0_6] : memref<256x256xbf16, #tpu.memory_space<vmem>>, vector<256x256xbf16>
    %c0_7 = arith.constant 0 : index
    %c0_8 = arith.constant 0 : index
    %4 = vector.load %arg7[%c0_7, %c0_8] : memref<1x256xbf16, #tpu.memory_space<vmem>>, vector<1x256xbf16>
    %c0_9 = arith.constant 0 : index
    %c0_10 = arith.constant 0 : index
    %5 = vector.load %arg8[%c0_9, %c0_10] : memref<256x9xbf16, #tpu.memory_space<vmem>>, vector<256x9xbf16>
    %c0_11 = arith.constant 0 : index
    %c0_12 = arith.constant 0 : index
    %6 = vector.load %arg9[%c0_11, %c0_12] : memref<1x9xf32, #tpu.memory_space<vmem>>, vector<1x9xf32>
    %c0_13 = arith.constant 0 : index
    %c0_14 = arith.constant 0 : index
    %7 = vector.load %arg1[%c0_13, %c0_14] : memref<8x9xbf16, #tpu.memory_space<vmem>>, vector<8x9xbf16>
    %c0_15 = arith.constant 0 : index
    %c0_16 = arith.constant 0 : index
    %8 = vector.load %arg2[%c0_15, %c0_16] : memref<8x1xf32, #tpu.memory_space<vmem>>, vector<8x1xf32>
    %cst = arith.constant dense<0.000000e+00> : vector<8x256xf32>
    %9 = tpu.matmul %7, %0, %cst {dimension_numbers = #tpu.dot_dimension_numbers<[1], [0], [0], [1], [0, 0, 1, 1], [], []>} : vector<8x9xbf16>, vector<9x256xbf16>, vector<8x256xf32> -> vector<8x256xf32>
    %10 = vector.broadcast %8 : vector<8x1xf32> to vector<8x256xf32>
    %11 = vector.broadcast %1 : vector<1x256xf32> to vector<8x256xf32>
    %12 = arith.mulf %10, %11 : vector<8x256xf32>
    %13 = arith.addf %9, %12 : vector<8x256xf32>
    %14 = arith.truncf %13 : vector<8x256xf32> to vector<8x256xbf16>
    %15 = vector.broadcast %2 : vector<1x256xbf16> to vector<8x256xbf16>
    %16 = arith.addf %14, %15 : vector<8x256xbf16>
    %17 = arith.negf %16 : vector<8x256xbf16>
    %18 = math.exp %17 : vector<8x256xbf16>
    %cst_17 = arith.constant 1.000000e+00 : bf16
    %19 = vector.broadcast %cst_17 : bf16 to vector<8x256xbf16>
    %20 = arith.addf %19, %18 : vector<8x256xbf16>
    %21 = arith.divf %19, %20 : vector<8x256xbf16>
    %22 = arith.mulf %21, %16 : vector<8x256xbf16>
    %cst_18 = arith.constant dense<0.000000e+00> : vector<8x256xf32>
    %23 = tpu.matmul %22, %3, %cst_18 {dimension_numbers = #tpu.dot_dimension_numbers<[1], [0], [0], [1], [0, 0, 1, 1], [], []>} : vector<8x256xbf16>, vector<256x256xbf16>, vector<8x256xf32> -> vector<8x256xf32>
    %24 = arith.truncf %23 : vector<8x256xf32> to vector<8x256xbf16>
    %25 = vector.broadcast %4 : vector<1x256xbf16> to vector<8x256xbf16>
    %26 = arith.addf %24, %25 : vector<8x256xbf16>
    %27 = arith.negf %26 : vector<8x256xbf16>
    %28 = math.exp %27 : vector<8x256xbf16>
    %cst_19 = arith.constant 1.000000e+00 : bf16
    %29 = vector.broadcast %cst_19 : bf16 to vector<8x256xbf16>
    %30 = arith.addf %29, %28 : vector<8x256xbf16>
    %31 = arith.divf %29, %30 : vector<8x256xbf16>
    %32 = arith.mulf %31, %26 : vector<8x256xbf16>
    %cst_20 = arith.constant dense<0.000000e+00> : vector<8x9xf32>
    %33 = tpu.matmul %32, %5, %cst_20 {dimension_numbers = #tpu.dot_dimension_numbers<[1], [0], [0], [1], [0, 0, 1, 1], [], []>} : vector<8x256xbf16>, vector<256x9xbf16>, vector<8x9xf32> -> vector<8x9xf32>
    %34 = vector.broadcast %6 : vector<1x9xf32> to vector<8x9xf32>
    %35 = arith.addf %33, %34 : vector<8x9xf32>
    %c0_21 = arith.constant 0 : index
    %c0_22 = arith.constant 0 : index
    %36 = vector.load %arg10[%c0_21, %c0_22] : memref<8x9xf32, #tpu.memory_space<vmem>>, vector<8x9xf32>
    tpu.vector_store %arg10[%c0_21, %c0_22], %35 {strides = array<i32>} : memref<8x9xf32, #tpu.memory_space<vmem>>, vector<8x9xf32>,
    return
  }
  func.func @transform_0(%arg0: i32) -> (i32, i32) {
    %c0_i32 = arith.constant 0 : i32
    %c0_i32_0 = arith.constant 0 : i32
    return %arg0, %c0_i32 : i32, i32
  }
  func.func @transform_1(%arg0: i32) -> (i32, i32) {
    %c0_i32 = arith.constant 0 : i32
    %c0_i32_0 = arith.constant 0 : i32
    return %arg0, %c0_i32 : i32, i32
  }
  func.func @transform_2(%arg0: i32) -> (i32, i32) {
    %c0_i32 = arith.constant 0 : i32
    %c0_i32_0 = arith.constant 0 : i32
    %c0_i32_1 = arith.constant 0 : i32
    return %c0_i32, %c0_i32_0 : i32, i32
  }
  func.func @transform_3(%arg0: i32) -> (i32, i32) {
    %c0_i32 = arith.constant 0 : i32
    %c0_i32_0 = arith.constant 0 : i32
    %c0_i32_1 = arith.constant 0 : i32
    return %c0_i32, %c0_i32_0 : i32, i32
  }
  func.func @transform_4(%arg0: i32) -> (i32, i32) {
    %c0_i32 = arith.constant 0 : i32
    %c0_i32_0 = arith.constant 0 : i32
    %c0_i32_1 = arith.constant 0 : i32
    return %c0_i32, %c0_i32_0 : i32, i32
  }
  func.func @transform_5(%arg0: i32) -> (i32, i32) {
    %c0_i32 = arith.constant 0 : i32
    %c0_i32_0 = arith.constant 0 : i32
    %c0_i32_1 = arith.constant 0 : i32
    return %c0_i32, %c0_i32_0 : i32, i32
  }
  func.func @transform_6(%arg0: i32) -> (i32, i32) {
    %c0_i32 = arith.constant 0 : i32
    %c0_i32_0 = arith.constant 0 : i32
    %c0_i32_1 = arith.constant 0 : i32
    return %c0_i32, %c0_i32_0 : i32, i32
  }
  func.func @transform_7(%arg0: i32) -> (i32, i32) {
    %c0_i32 = arith.constant 0 : i32
    %c0_i32_0 = arith.constant 0 : i32
    %c0_i32_1 = arith.constant 0 : i32
    return %c0_i32, %c0_i32_0 : i32, i32
  }
  func.func @transform_8(%arg0: i32) -> (i32, i32) {
    %c0_i32 = arith.constant 0 : i32
    %c0_i32_0 = arith.constant 0 : i32
    %c0_i32_1 = arith.constant 0 : i32
    return %c0_i32, %c0_i32_0 : i32, i32
  }
  func.func @transform_9(%arg0: i32) -> (i32, i32) {
    %c0_i32 = arith.constant 0 : i32
    %c0_i32_0 = arith.constant 0 : i32
    return %arg0, %c0_i32 : i32, i32
  }
}

</mosaic_0001>

<bundles_post_ra>
// kernel: tpu_custom_call.1
= control target key start
LH: loop header
LB: loop body
LE: loop exit
PB: predicated region body
PF: predicated region fallthrough
CT: control target
= control target key end

     0   :  { %14 = vsyncpa [#allocation3], 0  ;;  %s1040_s0 = inlined_call_operand.vmem [shape: bf16[8,9], index: 0, kind: input, shape index: {}]   ;;  %s1041_s1 = inlined_call_operand.vmem [shape: f32[8,1], index: 1, kind: input, shape index: {}]   ;;  %s1042_s2 = inlined_call_operand.vmem [shape: bf16[9,256], index: 2, kind: input, shape index: {}]   ;;  %s1043_s3 = inlined_call_operand.vmem [shape: f32[1,256], index: 3, kind: input, shape index: {}]   ;;  %s1044_s4 = inlined_call_operand.vmem [shape: bf16[1,256], index: 4, kind: input, shape index: {}]   ;;  %s1045_s5 = inlined_call_operand.hbm [shape: bf16[256,256], index: 5, kind: input, shape index: {}]   ;;  %s1046_s6 = inlined_call_operand.vmem [shape: bf16[1,256], index: 6, kind: input, shape index: {}]   ;;  %s1047_s7 = inlined_call_operand.vmem [shape: bf16[256,9], index: 7, kind: input, shape index: {}]   ;;  %s1048_s8 = inlined_call_operand.vmem [shape: f32[1,9], index: 8, kind: input, shape index: {}]   ;;  %s1049_s9 = inlined_call_operand.hbm [shape: f32[8,9], index: 9, kind: output, shape index: {}]  }
   0x1   :  { %15 = vsyncpa [#allocation4], 0  ;;  %s890_s30 = smov [#allocation2]  }
   0x2   :  { %s31_s10 = sshll.u32 %s890_s30, 4  ;;  %s32_s10 = int_to_ptr.vmem [resolvable:$true] %s31_s10 }
   0x3   :  { %s854_s11 = scalar_lea.vmem %s32_s10, 4096  ;;  %p859_p1 = scmp.lt.s32.totalorder %s32_s10, %s32_s10 }
   0x4   :  { %p855_p0 = scmp.ne.s32.totalorder %s32_s10, %s854_s11  ;;  %p860_p2 = scmp.lt.s32.totalorder %s854_s11, %s854_s11 }
   0x6   :  { %p861_p3 = por %p860_p2, %p859_p1 }
   0x8   :  { %p862_p4 = pnand %p861_p3, %p855_p0 }
   0xa   :  { %865 = shalt.err (!%p862_p4)
}
   0xb   :  { %s891_s12 = smov 128   ;;  %s892_s13 = smov 8  }
   0xc   :  { %37 = dma.hbm_to_vmem [thread:$0]  %s1045_s5, 4096, %s32_s10, [#allocation3], %s891_s12, %s891_s12, %s892_s13  }
   0xd   :  { %886 = dma.done.wait [#allocation3], 4096  }
   0xe   :  { %887 = vsyncadd [#allocation3], 4294963200  ;;  %vm151_vm0 = vcmask 1043456   ;;  %v893_v0 = vmov 0   ;;  %vm152_vm1 = vcmask 1044480   ;;  %v894_v1 = vmov 65535  }
   0xf   :  { %193 = vmatprep.mubr.bf16.mxu0 %v893_v0  ;;  %762 = vset.pattern.permute.xlu0 %v893_v0  ;;  %v153_v2 = vsel %vm151_vm0, 4294967295, %v894_v1  ;;  %v763_v4 = vld [vmem:[%s1042_s2 + $0x4] ss:$8 sps:$4 sm:$0x1f]   ;;  %v766_v8 = vld [vmem:[#allocation2 + $0x74] ss:$8 sps:$4 sm:$0xff]   ;;  %v127_v42 = vlaneseq }
  0x10   :  { %v154_v3 = vsel %vm152_vm1, %v153_v2, 0  ;;  %v765_v5 = vld [vmem:[%s1042_s2] ss:$8 sps:$4 sm:$0x1f]   ;;  %v768_v10 = vld [vmem:[#allocation2 + $0x70] ss:$8 sps:$4 sm:$0xff]   ;;  %419 = vmatprep.subr.bf16.mxu1 %v766_v8 }
  0x11   :  { %v120_v6 = vld [vmem:[%s1041_s1] sm:$0xff]  ;;  %v159_v7 = vand.u32 %v763_v4, %v154_v3  ;;  %v156_v9 = vand.u32 %v765_v5, %v154_v3  ;;  %vm147_vm2 = vcmask 72704   ;;  %420 = vmatpush1.bf16.msra.mxu1 %v768_v10  ;;  %v772_v14 = vld [vmem:[#allocation2 + $0x54] ss:$8 sps:$4 sm:$0xff]   ;;  %v774_v15 = vld [vmem:[#allocation2 + $0x50] ss:$8 sps:$4 sm:$0xff]  }
  0x12   :  { %123 = vperm.xlu0 %762, %v120_v6   ;;  %v769_v11 = vld [vmem:[#allocation2 + $0x64] ss:$8 sps:$4 sm:$0xff]   ;;  %v119_v12 = vld [vmem:[%s1040_s0] sm:$0xf]  ;;  %v778_v18 = vld [vmem:[#allocation2 + $0x34] ss:$8 sps:$4 sm:$0xff]  }
  0x13   :  { %175 = vmatprep.subr.bf16.mxu0 %v159_v7  ;;  %v771_v13 = vld [vmem:[#allocation2 + $0x60] ss:$8 sps:$4 sm:$0xff]   ;;  %421 = vmatprep.subr.bf16.mxu1 %v769_v11  ;;  %v775_v16 = vld [vmem:[#allocation2 + $0x44] ss:$8 sps:$4 sm:$0xff]   ;;  %v780_v19 = vld [vmem:[#allocation2 + $0x30] ss:$8 sps:$4 sm:$0xff]  }
  0x14   :  { %176 = vmatpush1.bf16.msra.mxu0 %v156_v9  ;;  %v777_v17 = vld [vmem:[#allocation2 + $0x40] ss:$8 sps:$4 sm:$0xff]   ;;  %v781_v20 = vld [vmem:[#allocation2 + $0x24] ss:$8 sps:$4 sm:$0xff]   ;;  %v784_v22 = vld [vmem:[#allocation2 + $0x14] ss:$8 sps:$4 sm:$0xff]  }
  0x15   :  { %422 = vmatpush1.bf16.msra.mxu1 %v771_v13  ;;  %v783_v21 = vld [vmem:[#allocation2 + $0x20] ss:$8 sps:$4 sm:$0xff]   ;;  %v786_v23 = vld [vmem:[#allocation2 + $0x10] ss:$8 sps:$4 sm:$0xff]   ;;  %v787_v24 = vld [vmem:[#allocation2 + $0x4] ss:$8 sps:$4 sm:$0xff]  }
  0x16   :  { %423 = vmatprep.subr.bf16.mxu1 %v772_v14  ;;  %v789_v25 = vld [vmem:[#allocation2] ss:$8 sps:$4 sm:$0xff]   ;;  %v790_v26 = vld [vmem:[#allocation2 + $0xf4] ss:$8 sps:$4 sm:$0xff]   ;;  %v792_v27 = vld [vmem:[#allocation2 + $0xf0] ss:$8 sps:$4 sm:$0xff]  }
  0x17   :  { %677 = vmatmul.mubr.msk.bf16.vlgmr.msra.gmra.mxu0 %vm147_vm2, %v119_v12  ;;  %v793_v28 = vld [vmem:[#allocation2 + $0xe4] ss:$8 sps:$4 sm:$0xff]   ;;  %v795_v29 = vld [vmem:[#allocation2 + $0xe0] ss:$8 sps:$4 sm:$0xff]   ;;  %v796_v30 = vld [vmem:[#allocation2 + $0xd4] ss:$8 sps:$4 sm:$0xff]  }
  0x18   :  { %v798_v31 = vld [vmem:[#allocation2 + $0xd0] ss:$8 sps:$4 sm:$0xff]   ;;  %v799_v32 = vld [vmem:[#allocation2 + $0xc4] ss:$8 sps:$4 sm:$0xff]   ;;  %v801_v33 = vld [vmem:[#allocation2 + $0xc0] ss:$8 sps:$4 sm:$0xff]  }
  0x19   :  { %424 = vmatpush1.bf16.msra.mxu1 %v774_v15  ;;  %v802_v34 = vld [vmem:[#allocation2 + $0xb4] ss:$8 sps:$4 sm:$0xff]   ;;  %v804_v35 = vld [vmem:[#allocation2 + $0xb0] ss:$8 sps:$4 sm:$0xff]   ;;  %v805_v36 = vld [vmem:[#allocation2 + $0xa4] ss:$8 sps:$4 sm:$0xff]  }
  0x1a   :  { %425 = vmatprep.subr.bf16.mxu1 %v775_v16  ;;  %v807_v37 = vld [vmem:[#allocation2 + $0xa0] ss:$8 sps:$4 sm:$0xff]   ;;  %v808_v38 = vld [vmem:[#allocation2 + $0x94] ss:$8 sps:$4 sm:$0xff]   ;;  %v810_v39 = vld [vmem:[#allocation2 + $0x90] ss:$8 sps:$4 sm:$0xff]  }
  0x1b   :  { %v811_v40 = vld [vmem:[#allocation2 + $0x84] ss:$8 sps:$4 sm:$0xff]   ;;  %v813_v41 = vld [vmem:[#allocation2 + $0x80] ss:$8 sps:$4 sm:$0xff]   ;;  %v895_v43 = vmov 1966171168  }
  0x1c   :  { %v214_v44 = vunpack.c.l.s4 %v895_v43  ;;  %v128_v45 = vshrl.u32 %v127_v42, 7  ;;  %v678_v47 = vld.sshfl [vmem:[%s1044_s4] sm:$0x11 pattern:$0x75316420]  ;;  %s896_s29 = smov [#allocation5]  }
  0x1d   :  { %426 = vmatpush1.bf16.msra.mxu1 %v777_v17  ;;  %v51_v50 = vld [vmem:[%s1043_s3] sm:$0x3]  ;;  %v212_v52 = vcombine.high %v678_v47, %v678_v47  ;;  %s666_s30 = sshll.u32 %s896_s29, 4  ;;  %s667_s30 = int_to_ptr.vmem [resolvable:$true] %s666_s30 }
  0x1e   :  { %427 = vmatprep.subr.bf16.mxu1 %v778_v18  ;;  %v215_v46 = vunpack.c.0.s8 %v214_v44  ;;  %v966_v48 = vsub.s32 0, %v128_v45  ;;  %v133_v51 = vsub.s32 1, %v128_v45  ;;  %s866_s10 = scalar_lea.vmem %s667_s30, 128  ;;  %p871_p6 = scmp.lt.s32.totalorder %s667_s30, %s667_s30 }
  0x1f   :  { %p867_p5 = scmp.ne.s32.totalorder %s667_s30, %s866_s10  ;;  %p872_p7 = scmp.lt.s32.totalorder %s866_s10, %s866_s10 }
  0x20   :  { %v968_v49 = vsub.s32 %v215_v46, %v128_v45  ;;  %v130_v53 = vrot.slane %v51_v50, %v966_v48  ;;  %v134_v56 = vrot.slane %v51_v50, %v133_v51 }
  0x21   :  { %428 = vmatpush1.bf16.msra.mxu1 %v780_v19  ;;  %p873_p8 = por %p872_p7, %p871_p6 }
  0x22   :  { %429 = vmatprep.subr.bf16.mxu1 %v781_v20  ;;  %v219_v54 = vrot.slane %v678_v47, %v968_v49  ;;  %v226_v57 = vrot.slane %v212_v52, %v968_v49 }
  0x23   :  { %p874_p9 = pnand %p873_p8, %p867_p5 }
  0x24   :  { %v228_v59 = vpack.i.b16 %v219_v54, %v219_v54  ;;  %v235_v61 = vpack.i.b16 %v226_v57, %v226_v57 }
  0x25   :  { %430 = vmatpush1.bf16.msra.mxu1 %v783_v21 }
  0x26   :  { %431 = vmatprep.subr.bf16.mxu1 %v784_v22  ;;  %v233_v0 = vrot.slane %v228_v59, %v966_v48  ;;  %v240_v4 = vrot.slane %v235_v61, %v966_v48  ;;  %v814_v22 = vld [vmem:[%s1047_s7 + $0x78] sm:$0xff]  }
  0x27   :  { %733 = vmatprep.subr.bf16.mxu0 %v814_v22 }
  0x29   :  { %432 = vmatpush1.bf16.msra.mxu1 %v786_v23  ;;  %v815_v23 = vld [vmem:[%s1047_s7 + $0x38] sm:$0xff]  }
  0x2a   :  { %433 = vmatprep.subr.bf16.mxu1 %v787_v24  ;;  %734 = vmatpush3.bf16.msra.mxu0 %v815_v23  ;;  %v816_v24 = vld [vmem:[%s1047_s7 + $0x70] sm:$0xff]  }
  0x2b   :  { %735 = vmatprep.subr.bf16.mxu0 %v816_v24 }
  0x2d   :  { %434 = vmatpush1.bf16.msra.mxu1 %v789_v25  ;;  %v817_v25 = vld [vmem:[%s1047_s7 + $0x30] sm:$0xff]  }
  0x2e   :  { %435 = vmatprep.subr.bf16.mxu1 %v790_v26  ;;  %736 = vmatpush3.bf16.msra.mxu0 %v817_v25  ;;  %v818_v26 = vld [vmem:[%s1047_s7 + $0x68] sm:$0xff]  }
  0x2f   :  { %737 = vmatprep.subr.bf16.mxu0 %v818_v26 }
  0x31   :  { %436 = vmatpush2.bf16.msra.mxu1 %v792_v27  ;;  %v819_v27 = vld [vmem:[%s1047_s7 + $0x28] sm:$0xff]  }
  0x32   :  { %437 = vmatprep.subr.bf16.mxu1 %v793_v28  ;;  %738 = vmatpush3.bf16.msra.mxu0 %v819_v27  ;;  %v820_v28 = vld [vmem:[%s1047_s7 + $0x60] sm:$0xff]  }
  0x33   :  { %739 = vmatprep.subr.bf16.mxu0 %v820_v28 }
  0x35   :  { %438 = vmatpush2.bf16.msra.mxu1 %v795_v29  ;;  %v821_v29 = vld [vmem:[%s1047_s7 + $0x20] sm:$0xff]  }
  0x36   :  { %439 = vmatprep.subr.bf16.mxu1 %v796_v30  ;;  %740 = vmatpush3.bf16.msra.mxu0 %v821_v29  ;;  %v822_v30 = vld [vmem:[%s1047_s7 + $0x58] sm:$0xff]  }
  0x37   :  { %741 = vmatprep.subr.bf16.mxu0 %v822_v30 }
  0x39   :  { %440 = vmatpush2.bf16.msra.mxu1 %v798_v31  ;;  %v823_v31 = vld [vmem:[%s1047_s7 + $0x18] sm:$0xff]  }
  0x3a   :  { %441 = vmatprep.subr.bf16.mxu1 %v799_v32  ;;  %742 = vmatpush3.bf16.msra.mxu0 %v823_v31  ;;  %v824_v32 = vld [vmem:[%s1047_s7 + $0x50] sm:$0xff]  }
  0x3b   :  { %743 = vmatprep.subr.bf16.mxu0 %v824_v32 }
  0x3d   :  { %442 = vmatpush2.bf16.msra.mxu1 %v801_v33  ;;  %v825_v33 = vld [vmem:[%s1047_s7 + $0x10] sm:$0xff]  }
  0x3e   :  { %443 = vmatprep.subr.bf16.mxu1 %v802_v34  ;;  %744 = vmatpush3.bf16.msra.mxu0 %v825_v33  ;;  %v826_v34 = vld [vmem:[%s1047_s7 + $0x48] sm:$0xff]  }
  0x3f   :  { %745 = vmatprep.subr.bf16.mxu0 %v826_v34 }
  0x41   :  { %444 = vmatpush2.bf16.msra.mxu1 %v804_v35  ;;  %v827_v35 = vld [vmem:[%s1047_s7 + $0x8] sm:$0xff]  }
  0x42   :  { %445 = vmatprep.subr.bf16.mxu1 %v805_v36  ;;  %746 = vmatpush3.bf16.msra.mxu0 %v827_v35  ;;  %v828_v36 = vld [vmem:[%s1047_s7 + $0x40] sm:$0xff]  }
  0x43   :  { %747 = vmatprep.subr.bf16.mxu0 %v828_v36 }
  0x45   :  { %446 = vmatpush2.bf16.msra.mxu1 %v807_v37  ;;  %v829_v37 = vld [vmem:[%s1047_s7] sm:$0xff]  }
  0x46   :  { %447 = vmatprep.subr.bf16.mxu1 %v808_v38  ;;  %748 = vmatpush3.bf16.msra.mxu0 %v829_v37  ;;  %v713_v38 = vld.sshfl [vmem:[%s1046_s6] sm:$0x11 pattern:$0x75316420] }
  0x49   :  { %448 = vmatpush2.bf16.msra.mxu1 %v810_v39  ;;  %v470_v39 = vcombine.high %v713_v38, %v713_v38 }
  0x4a   :  { %449 = vmatprep.subr.bf16.mxu1 %v811_v40  ;;  %v477_v40 = vrot.slane %v713_v38, %v968_v49 }
  0x4c   :  { %v486_v42 = vpack.i.b16 %v477_v40, %v477_v40 }
  0x4d   :  { %450 = vmatpush2.bf16.msra.mxu1 %v813_v41  ;;  %v484_v41 = vrot.slane %v470_v39, %v968_v49 }
  0x4e   :  { %v491_v44 = vrot.slane %v486_v42, %v966_v48 }
  0x4f   :  { %v493_v43 = vpack.i.b16 %v484_v41, %v484_v41 }
  0x51   :  { %v498_v47 = vrot.slane %v493_v43, %v966_v48 }
  0x8d   :  { %v124_v55 = vpop.permute.xlu0 %123 }
  0x8e   :  { %v137_v58 = vmul.f32 %v130_v53, %v124_v55  ;;  %v138_v60 = vmul.f32 %v134_v56, %v124_v55 }
  0xd7   :  { %v195_v62 = vpop.f32.mrf.mxu0 }
  0xd8   :  { %v196_v63 = vadd.f32 %v195_v62, %v137_v58 }
  0xd9   :  { %v197_v1 = vpop.f32.mrf.mxu0 }
  0xda   :  { %v202_v2 = vpack.c.bf16 %v196_v63, %v196_v63  ;;  %v198_v3 = vadd.f32 %v197_v1, %v138_v60 }
  0xdb   :  { %v199_v5 = vpop.f32.mrf.mxu0 }
  0xdc   :  { %v241_v6 = vadd.bf16 %v233_v0, %v202_v2  ;;  %v203_v7 = vpack.c.bf16 %v198_v3, %v198_v3  ;;  %v716_v3 = vld [vmem:[%s1048_s8] ss:$0 sm:$0xff] }
  0xdd   :  { %v200_v8 = vpop.f32.mrf.mxu0 }
  0xde   :  { %v679_v9 = vmul.bf16 3216621497, %v241_v6  ;;  %v242_v10 = vadd.bf16 %v240_v4, %v203_v7 }
  0xe0   :  { %830 = vpow.bf16 %v679_v9  ;;  %v680_v11 = vmul.bf16 3216621497, %v242_v10 }
  0xe2   :  { %832 = vpow.bf16 %v680_v11 }
  0xee   :  { %v831_v12 = vpop.eup %830 }
  0xef   :  { %v251_v13 = vadd.bf16 1065369472, %v831_v12 }
  0xf0   :  { %v833_v14 = vpop.eup %832 }
  0xf1   :  { %v252_v15 = vadd.bf16 1065369472, %v833_v14  ;;  %834 = vrcp.bf16 %v251_v13 }
  0xf3   :  { %836 = vrcp.bf16 %v252_v15 }
  0xff   :  { %v835_v16 = vpop.eup %834 }
 0x100   :  { %v254_v18 = vmul.bf16 1065369472, %v835_v16 }
 0x101   :  { %v837_v17 = vpop.eup %836 }
 0x102   :  { %v256_v19 = vmul.bf16 1065369472, %v837_v17  ;;  %v257_v21 = vmul.bf16 %v254_v18, %v241_v6 }
 0x104   :  { %v258_v20 = vmul.bf16 %v256_v19, %v242_v10 }
 0x106   :  { %451 = vmatprep.mubr.bf16.mxu1 %v258_v20 }
 0x107   :  { %452 = vmatmul.mubr.bf16.vlgmr.msra.gmra.mxu1 %v257_v21 }
 0x1c7   :  { %v453_v45 = vpop.f32.mrf.mxu1 }
 0x1c8   :  { %v460_v46 = vpack.c.bf16 %v453_v45, %v453_v45 }
 0x1c9   :  { %v455_v50 = vpop.f32.mrf.mxu1 }
 0x1ca   :  { %v499_v51 = vadd.bf16 %v491_v44, %v460_v46  ;;  %v461_v52 = vpack.c.bf16 %v455_v50, %v455_v50 }
 0x1cb   :  { %v457_v53 = vpop.f32.mrf.mxu1 }
 0x1cc   :  { %v714_v54 = vmul.bf16 3216621497, %v499_v51  ;;  %v500_v55 = vadd.bf16 %v498_v47, %v461_v52 }
 0x1cd   :  { %v458_v56 = vpop.f32.mrf.mxu1 }
 0x1ce   :  { %838 = vpow.bf16 %v714_v54  ;;  %v715_v57 = vmul.bf16 3216621497, %v500_v55 }
 0x1d0   :  { %840 = vpow.bf16 %v715_v57 }
 0x1dc   :  { %v839_v58 = vpop.eup %838 }
 0x1dd   :  { %v509_v49 = vadd.bf16 1065369472, %v839_v58 }
 0x1de   :  { %v841_v59 = vpop.eup %840 }
 0x1df   :  { %842 = vrcp.bf16 %v509_v49  ;;  %v510_v60 = vadd.bf16 1065369472, %v841_v59 }
 0x1e1   :  { %844 = vrcp.bf16 %v510_v60 }
 0x1ed   :  { %v843_v61 = vpop.eup %842 }
 0x1ee   :  { %v512_v63 = vmul.bf16 1065369472, %v843_v61 }
 0x1ef   :  { %v845_v62 = vpop.eup %844 }
 0x1f0   :  { %v514_v48 = vmul.bf16 1065369472, %v845_v62  ;;  %v515_v1 = vmul.bf16 %v512_v63, %v499_v51 }
 0x1f2   :  { %v516_v0 = vmul.bf16 %v514_v48, %v500_v55 }
 0x1f4   :  { %651 = vmatprep.mubr.bf16.mxu0 %v516_v0 }
 0x1f5   :  { %652 = vmatmul.mubr.bf16.vlgmr.msra.gmra.mxu0 %v515_v1 }
 0x2b5   :  { %v749_v2 = vpop.f32.mrf.mxu0 }
 0x2b7   :  { %v750_v4 = vpop.f32.mrf.mxu0 }
 0x2b8   :  { %v751_v5 = vadd.f32 %v750_v4, %v749_v2 }
 0x2b9   :  { %v752_v6 = vpop.f32.mrf.mxu0 }
 0x2ba   :  { %v654_v7 = vadd.f32 %v751_v5, %v716_v3 }
 0x2bb   :  { %v753_v8 = vpop.f32.mrf.mxu0 }
 0x2bc   :  { %659 = vst.msk [vmem:[#allocation5] sm:$0xff] %vm147_vm2, %v654_v7 }
 0x2bd   :  { %877 = shalt.err (!%p874_p9)
}
 0x2be   :  { %669 = dma.vmem_to_hbm [thread:$0]  %s667_s30, 128, %s1049_s9, [#allocation4]  }
 0x2bf   :  { %888 = dma.done.wait [#allocation4], 128  }
 0x2c0   :  { %889 = vsyncadd [#allocation4], 4294967168 }
 0x2c1   :  { %673 = vsyncpa [#allocation3], 1 }
 0x2c2   :  { %674 = vsyncpa [#allocation4], 1 }

</bundles_post_ra>
